<compile_context>
chip_gen: v7x
topology: tpu7x:2x2x1
jax: 0.10.0
libtpu: 0.0.40
codegen_flags: <defaults>
</compile_context>

<pallas_src>
import jax
import jax.numpy as jnp
from jax.experimental import pallas as pl
from jax.experimental.pallas import tpu as pltpu


def sentences_encoder_kernel(
    x_ref,        # (S, V)
    wcomb_ref,    # (V, 3H)  = W_e^T @ W_i^T  (gate order r|z|n)
    bcomb_ref,    # (1, 3H)  = b_e @ W_i^T + b_i + [b_hr | b_hz | 0]
    whf_ref,      # (H, 3H)  = [W_hr^T | W_hz^T | W_hn^T]
    bhn_ref,      # (1, H)
    out_ref,      # (1, H)
):
    S = x_ref.shape[0]
    H = out_ref.shape[1]

    # Single fused matmul: input-side gate pre-activations for all timesteps.
    # (Embed Linear + 3 gate matmuls + all foldable biases are pre-composed in
    #  the wrapper.)  Result is tiny -> kept in vregs, no VMEM scratch.
    gi = (jnp.dot(x_ref[...], wcomb_ref[...], preferred_element_type=jnp.float32)
          + bcomb_ref[...])                                        # (S, 3H)

    whf = whf_ref[...]
    bhn = bhn_ref[...]

    # GRU recurrence (PyTorch semantics), fully unrolled (S static & small):
    #   r = sigmoid(gi_r[t] + W_hr h)          (biases pre-folded)
    #   z = sigmoid(gi_z[t] + W_hz h)
    #   n = tanh   (gi_n[t] + r * (W_hn h + b_hn))
    #   h = (1 - z) * n + z * h
    h = jnp.zeros((1, H), jnp.float32)
    for t in range(S):
        gh = jnp.dot(h, whf, preferred_element_type=jnp.float32)        # (1, 3H)
        rz = jax.nn.sigmoid(gi[t:t + 1, :2 * H] + gh[:, :2 * H])        # one EUP pass
        r = rz[:, :H]
        z = rz[:, H:]
        n = jnp.tanh(gi[t:t + 1, 2 * H:] + r * (gh[:, 2 * H:] + bhn))
        h = (1.0 - z) * n + z * h

    out_ref[...] = jnp.abs(h)


def sentences_encoder(x, params):
    """Pallas wrapper: whole problem fits in VMEM at these sizes -> single grid point."""
    S, V = x.shape
    H = params["w_hh"].shape[1]

    w_e = params["w_embed"].astype(jnp.float32)   # (E, V)
    b_e = params["b_embed"].astype(jnp.float32)   # (E,)
    w_ih = params["w_ih"].astype(jnp.float32)     # (3H, E), rows = [r | z | n]
    w_hh = params["w_hh"].astype(jnp.float32)     # (3H, H)
    b_ih = params["b_ih"].astype(jnp.float32)     # (3H,)
    b_hh = params["b_hh"].astype(jnp.float32)     # (3H,)

    # One-time wrapper-side folds (plain JAX, outside the latency path):
    #   embed Linear composed into the input-side gate weights,
    #   embed bias + input biases + hidden r/z biases composed into one bias row.
    w_comb = w_e.T @ w_ih.T                                            # (V, 3H)
    b_comb = b_e @ w_ih.T + b_ih                                       # (3H,)
    b_comb = b_comb + jnp.concatenate([b_hh[:2 * H],
                                       jnp.zeros((H,), jnp.float32)])  # fold b_hr, b_hz
    b_comb = b_comb.reshape(1, 3 * H)

    w_h_fused = w_hh.T                                                 # (H, 3H)
    b_hn = b_hh[2 * H:].reshape(1, H)                                  # stays in-kernel

    args = (x.astype(jnp.float32), w_comb, b_comb, w_h_fused, b_hn)

    def full_spec(shape):
        return pl.BlockSpec(shape, lambda *_: tuple(0 for _ in shape))

    # TODO(synk): if V/E/H grow to realistic sizes, tile the (S,V)@(V,3H)
    # precompute over V with an accumulator instead of full-array BlockSpecs.
    return pl.pallas_call(
        sentences_encoder_kernel,
        out_shape=jax.ShapeDtypeStruct((1, H), jnp.float32),
        in_specs=[full_spec(a.shape) for a in args],
        out_specs=full_spec((1, H)),
    )(*args)


def reference(x, params):
    """Pure-JAX reference replicating the PyTorch forward exactly."""
    emb = x @ params["w_embed"].T + params["b_embed"]
    H = params["w_hh"].shape[1]
    w_ih, w_hh = params["w_ih"], params["w_hh"]
    b_ih, b_hh = params["b_ih"], params["b_hh"]
    h = jnp.zeros((1, H), jnp.float32)
    for t in range(x.shape[0]):
        x_t = emb[t:t + 1]
        gi = x_t @ w_ih.T + b_ih
        gh = h @ w_hh.T + b_hh
        r = jax.nn.sigmoid(gi[:, :H] + gh[:, :H])
        z = jax.nn.sigmoid(gi[:, H:2 * H] + gh[:, H:2 * H])
        n = jnp.tanh(gi[:, 2 * H:] + r * gh[:, 2 * H:])
        h = (1.0 - z) * n + z * h
    return jnp.abs(h)


def init_params(key, vocab_size, embed_size, common_size):
    ks = jax.random.split(key, 6)
    k_e = 1.0 / jnp.sqrt(vocab_size)
    k_g = 1.0 / jnp.sqrt(common_size)
    return {
        "w_embed": jax.random.uniform(ks[0], (embed_size, vocab_size), jnp.float32, -k_e, k_e),
        "b_embed": jax.random.uniform(ks[1], (embed_size,), jnp.float32, -k_e, k_e),
        "w_ih": jax.random.uniform(ks[2], (3 * common_size, embed_size), jnp.float32, -k_g, k_g),
        "w_hh": jax.random.uniform(ks[3], (3 * common_size, common_size), jnp.float32, -k_g, k_g),
        "b_ih": jax.random.uniform(ks[4], (3 * common_size,), jnp.float32, -k_g, k_g),
        "b_hh": jax.random.uniform(ks[5], (3 * common_size,), jnp.float32, -k_g, k_g),
    }


if __name__ == "__main__":
    SEQ_LEN, VOCAB_SIZE, WORD_EMBEDDING_SIZE, COMMON_SIZE = 8, 32, 16, 32

    key = jax.random.PRNGKey(0)
    k_x, k_p = jax.random.split(key)
    x = jax.random.normal(k_x, (SEQ_LEN, VOCAB_SIZE), jnp.float32)
    params = init_params(k_p, VOCAB_SIZE, WORD_EMBEDDING_SIZE, COMMON_SIZE)

    out = sentences_encoder(x, params)
    out = jax.block_until_ready(out)

    ref = reference(x, params)
    assert out.shape == (1, COMMON_SIZE), out.shape
    assert jnp.allclose(out, ref, atol=1e-5, rtol=1e-5), (out, ref)
    print("KERNEL_OK")
</pallas_src>

<mosaic_0001>
module attributes {stable_mosaic.version = 11 : i64} {
  func.func @sentences_encoder_kernel(%arg0: memref<8x32xf32, #tpu.memory_space<vmem>>, %arg1: memref<32x96xf32, #tpu.memory_space<vmem>>, %arg2: memref<1x96xf32, #tpu.memory_space<vmem>>, %arg3: memref<32x96xf32, #tpu.memory_space<vmem>>, %arg4: memref<1x32xf32, #tpu.memory_space<vmem>>, %arg5: memref<1x32xf32, #tpu.memory_space<vmem>>) attributes {dimension_semantics = [], scalar_prefetch = 0 : i64, scratch_operands = 0 : i64, tpu.core_type = #tpu.core_type<tc>} {
    %c0 = arith.constant 0 : index
    %c0_0 = arith.constant 0 : index
    %0 = vector.load %arg0[%c0, %c0_0] : memref<8x32xf32, #tpu.memory_space<vmem>>, vector<8x32xf32>
    %c0_1 = arith.constant 0 : index
    %c0_2 = arith.constant 0 : index
    %1 = vector.load %arg1[%c0_1, %c0_2] : memref<32x96xf32, #tpu.memory_space<vmem>>, vector<32x96xf32>
    %cst = arith.constant dense<0.000000e+00> : vector<8x96xf32>
    %2 = tpu.matmul %0, %1, %cst {dimension_numbers = #tpu.dot_dimension_numbers<[1], [0], [0], [1], [0, 0, 1, 1], [], []>} : vector<8x32xf32>, vector<32x96xf32>, vector<8x96xf32> -> vector<8x96xf32>
    %c0_3 = arith.constant 0 : index
    %c0_4 = arith.constant 0 : index
    %3 = vector.load %arg2[%c0_3, %c0_4] : memref<1x96xf32, #tpu.memory_space<vmem>>, vector<1x96xf32>
    %4 = vector.broadcast %3 : vector<1x96xf32> to vector<8x96xf32>
    %5 = arith.addf %2, %4 : vector<8x96xf32>
    %c0_5 = arith.constant 0 : index
    %c0_6 = arith.constant 0 : index
    %6 = vector.load %arg3[%c0_5, %c0_6] : memref<32x96xf32, #tpu.memory_space<vmem>>, vector<32x96xf32>
    %c0_7 = arith.constant 0 : index
    %c0_8 = arith.constant 0 : index
    %7 = vector.load %arg4[%c0_7, %c0_8] : memref<1x32xf32, #tpu.memory_space<vmem>>, vector<1x32xf32>
    %cst_9 = arith.constant 0.000000e+00 : f32
    %8 = vector.broadcast %cst_9 : f32 to vector<1x32xf32>
    %cst_10 = arith.constant dense<0.000000e+00> : vector<1x96xf32>
    %9 = tpu.matmul %8, %6, %cst_10 {dimension_numbers = #tpu.dot_dimension_numbers<[1], [0], [0], [1], [0, 0, 1, 1], [], []>} : vector<1x32xf32>, vector<32x96xf32>, vector<1x96xf32> -> vector<1x96xf32>
    %10 = vector.extract_strided_slice %5 {offsets = [0, 0], sizes = [1, 64], strides = [1, 1]} : vector<8x96xf32> to vector<1x64xf32>
    %11 = vector.extract_strided_slice %9 {offsets = [0, 0], sizes = [1, 64], strides = [1, 1]} : vector<1x96xf32> to vector<1x64xf32>
    %12 = arith.addf %10, %11 : vector<1x64xf32>
    %13 = arith.negf %12 : vector<1x64xf32>
    %14 = math.exp %13 : vector<1x64xf32>
    %cst_11 = arith.constant 1.000000e+00 : f32
    %15 = vector.broadcast %cst_11 : f32 to vector<1x64xf32>
    %16 = arith.addf %15, %14 : vector<1x64xf32>
    %17 = arith.divf %15, %16 : vector<1x64xf32>
    %18 = vector.extract_strided_slice %17 {offsets = [0, 0], sizes = [1, 32], strides = [1, 1]} : vector<1x64xf32> to vector<1x32xf32>
    %19 = vector.extract_strided_slice %17 {offsets = [0, 32], sizes = [1, 32], strides = [1, 1]} : vector<1x64xf32> to vector<1x32xf32>
    %20 = vector.extract_strided_slice %5 {offsets = [0, 64], sizes = [1, 32], strides = [1, 1]} : vector<8x96xf32> to vector<1x32xf32>
    %21 = vector.extract_strided_slice %9 {offsets = [0, 64], sizes = [1, 32], strides = [1, 1]} : vector<1x96xf32> to vector<1x32xf32>
    %22 = arith.addf %21, %7 : vector<1x32xf32>
    %23 = arith.mulf %18, %22 : vector<1x32xf32>
    %24 = arith.addf %20, %23 : vector<1x32xf32>
    %25 = math.tanh %24 : vector<1x32xf32>
    %cst_12 = arith.constant 1.000000e+00 : f32
    %26 = vector.broadcast %cst_12 : f32 to vector<1x32xf32>
    %27 = arith.subf %26, %19 : vector<1x32xf32>
    %28 = arith.mulf %27, %25 : vector<1x32xf32>
    %29 = arith.mulf %19, %8 : vector<1x32xf32>
    %30 = arith.addf %28, %29 : vector<1x32xf32>
    %cst_13 = arith.constant dense<0.000000e+00> : vector<1x96xf32>
    %31 = tpu.matmul %30, %6, %cst_13 {dimension_numbers = #tpu.dot_dimension_numbers<[1], [0], [0], [1], [0, 0, 1, 1], [], []>} : vector<1x32xf32>, vector<32x96xf32>, vector<1x96xf32> -> vector<1x96xf32>
    %32 = vector.extract_strided_slice %5 {offsets = [1, 0], sizes = [1, 64], strides = [1, 1]} : vector<8x96xf32> to vector<1x64xf32>
    %33 = vector.extract_strided_slice %31 {offsets = [0, 0], sizes = [1, 64], strides = [1, 1]} : vector<1x96xf32> to vector<1x64xf32>
    %34 = arith.addf %32, %33 : vector<1x64xf32>
    %35 = arith.negf %34 : vector<1x64xf32>
    %36 = math.exp %35 : vector<1x64xf32>
    %cst_14 = arith.constant 1.000000e+00 : f32
    %37 = vector.broadcast %cst_14 : f32 to vector<1x64xf32>
    %38 = arith.addf %37, %36 : vector<1x64xf32>
    %39 = arith.divf %37, %38 : vector<1x64xf32>
    %40 = vector.extract_strided_slice %39 {offsets = [0, 0], sizes = [1, 32], strides = [1, 1]} : vector<1x64xf32> to vector<1x32xf32>
    %41 = vector.extract_strided_slice %39 {offsets = [0, 32], sizes = [1, 32], strides = [1, 1]} : vector<1x64xf32> to vector<1x32xf32>
    %42 = vector.extract_strided_slice %5 {offsets = [1, 64], sizes = [1, 32], strides = [1, 1]} : vector<8x96xf32> to vector<1x32xf32>
    %43 = vector.extract_strided_slice %31 {offsets = [0, 64], sizes = [1, 32], strides = [1, 1]} : vector<1x96xf32> to vector<1x32xf32>
    %44 = arith.addf %43, %7 : vector<1x32xf32>
    %45 = arith.mulf %40, %44 : vector<1x32xf32>
    %46 = arith.addf %42, %45 : vector<1x32xf32>
    %47 = math.tanh %46 : vector<1x32xf32>
    %cst_15 = arith.constant 1.000000e+00 : f32
    %48 = vector.broadcast %cst_15 : f32 to vector<1x32xf32>
    %49 = arith.subf %48, %41 : vector<1x32xf32>
    %50 = arith.mulf %49, %47 : vector<1x32xf32>
    %51 = arith.mulf %41, %30 : vector<1x32xf32>
    %52 = arith.addf %50, %51 : vector<1x32xf32>
    %cst_16 = arith.constant dense<0.000000e+00> : vector<1x96xf32>
    %53 = tpu.matmul %52, %6, %cst_16 {dimension_numbers = #tpu.dot_dimension_numbers<[1], [0], [0], [1], [0, 0, 1, 1], [], []>} : vector<1x32xf32>, vector<32x96xf32>, vector<1x96xf32> -> vector<1x96xf32>
    %54 = vector.extract_strided_slice %5 {offsets = [2, 0], sizes = [1, 64], strides = [1, 1]} : vector<8x96xf32> to vector<1x64xf32>
    %55 = vector.extract_strided_slice %53 {offsets = [0, 0], sizes = [1, 64], strides = [1, 1]} : vector<1x96xf32> to vector<1x64xf32>
    %56 = arith.addf %54, %55 : vector<1x64xf32>
    %57 = arith.negf %56 : vector<1x64xf32>
    %58 = math.exp %57 : vector<1x64xf32>
    %cst_17 = arith.constant 1.000000e+00 : f32
    %59 = vector.broadcast %cst_17 : f32 to vector<1x64xf32>
    %60 = arith.addf %59, %58 : vector<1x64xf32>
    %61 = arith.divf %59, %60 : vector<1x64xf32>
    %62 = vector.extract_strided_slice %61 {offsets = [0, 0], sizes = [1, 32], strides = [1, 1]} : vector<1x64xf32> to vector<1x32xf32>
    %63 = vector.extract_strided_slice %61 {offsets = [0, 32], sizes = [1, 32], strides = [1, 1]} : vector<1x64xf32> to vector<1x32xf32>
    %64 = vector.extract_strided_slice %5 {offsets = [2, 64], sizes = [1, 32], strides = [1, 1]} : vector<8x96xf32> to vector<1x32xf32>
    %65 = vector.extract_strided_slice %53 {offsets = [0, 64], sizes = [1, 32], strides = [1, 1]} : vector<1x96xf32> to vector<1x32xf32>
    %66 = arith.addf %65, %7 : vector<1x32xf32>
    %67 = arith.mulf %62, %66 : vector<1x32xf32>
    %68 = arith.addf %64, %67 : vector<1x32xf32>
    %69 = math.tanh %68 : vector<1x32xf32>
    %cst_18 = arith.constant 1.000000e+00 : f32
    %70 = vector.broadcast %cst_18 : f32 to vector<1x32xf32>
    %71 = arith.subf %70, %63 : vector<1x32xf32>
    %72 = arith.mulf %71, %69 : vector<1x32xf32>
    %73 = arith.mulf %63, %52 : vector<1x32xf32>
    %74 = arith.addf %72, %73 : vector<1x32xf32>
    %cst_19 = arith.constant dense<0.000000e+00> : vector<1x96xf32>
    %75 = tpu.matmul %74, %6, %cst_19 {dimension_numbers = #tpu.dot_dimension_numbers<[1], [0], [0], [1], [0, 0, 1, 1], [], []>} : vector<1x32xf32>, vector<32x96xf32>, vector<1x96xf32> -> vector<1x96xf32>
    %76 = vector.extract_strided_slice %5 {offsets = [3, 0], sizes = [1, 64], strides = [1, 1]} : vector<8x96xf32> to vector<1x64xf32>
    %77 = vector.extract_strided_slice %75 {offsets = [0, 0], sizes = [1, 64], strides = [1, 1]} : vector<1x96xf32> to vector<1x64xf32>
    %78 = arith.addf %76, %77 : vector<1x64xf32>
    %79 = arith.negf %78 : vector<1x64xf32>
    %80 = math.exp %79 : vector<1x64xf32>
    %cst_20 = arith.constant 1.000000e+00 : f32
    %81 = vector.broadcast %cst_20 : f32 to vector<1x64xf32>
    %82 = arith.addf %81, %80 : vector<1x64xf32>
    %83 = arith.divf %81, %82 : vector<1x64xf32>
    %84 = vector.extract_strided_slice %83 {offsets = [0, 0], sizes = [1, 32], strides = [1, 1]} : vector<1x64xf32> to vector<1x32xf32>
    %85 = vector.extract_strided_slice %83 {offsets = [0, 32], sizes = [1, 32], strides = [1, 1]} : vector<1x64xf32> to vector<1x32xf32>
    %86 = vector.extract_strided_slice %5 {offsets = [3, 64], sizes = [1, 32], strides = [1, 1]} : vector<8x96xf32> to vector<1x32xf32>
    %87 = vector.extract_strided_slice %75 {offsets = [0, 64], sizes = [1, 32], strides = [1, 1]} : vector<1x96xf32> to vector<1x32xf32>
    %88 = arith.addf %87, %7 : vector<1x32xf32>
    %89 = arith.mulf %84, %88 : vector<1x32xf32>
    %90 = arith.addf %86, %89 : vector<1x32xf32>
    %91 = math.tanh %90 : vector<1x32xf32>
    %cst_21 = arith.constant 1.000000e+00 : f32
    %92 = vector.broadcast %cst_21 : f32 to vector<1x32xf32>
    %93 = arith.subf %92, %85 : vector<1x32xf32>
    %94 = arith.mulf %93, %91 : vector<1x32xf32>
    %95 = arith.mulf %85, %74 : vector<1x32xf32>
    %96 = arith.addf %94, %95 : vector<1x32xf32>
    %cst_22 = arith.constant dense<0.000000e+00> : vector<1x96xf32>
    %97 = tpu.matmul %96, %6, %cst_22 {dimension_numbers = #tpu.dot_dimension_numbers<[1], [0], [0], [1], [0, 0, 1, 1], [], []>} : vector<1x32xf32>, vector<32x96xf32>, vector<1x96xf32> -> vector<1x96xf32>
    %98 = vector.extract_strided_slice %5 {offsets = [4, 0], sizes = [1, 64], strides = [1, 1]} : vector<8x96xf32> to vector<1x64xf32>
    %99 = vector.extract_strided_slice %97 {offsets = [0, 0], sizes = [1, 64], strides = [1, 1]} : vector<1x96xf32> to vector<1x64xf32>
    %100 = arith.addf %98, %99 : vector<1x64xf32>
    %101 = arith.negf %100 : vector<1x64xf32>
    %102 = math.exp %101 : vector<1x64xf32>
    %cst_23 = arith.constant 1.000000e+00 : f32
    %103 = vector.broadcast %cst_23 : f32 to vector<1x64xf32>
    %104 = arith.addf %103, %102 : vector<1x64xf32>
    %105 = arith.divf %103, %104 : vector<1x64xf32>
    %106 = vector.extract_strided_slice %105 {offsets = [0, 0], sizes = [1, 32], strides = [1, 1]} : vector<1x64xf32> to vector<1x32xf32>
    %107 = vector.extract_strided_slice %105 {offsets = [0, 32], sizes = [1, 32], strides = [1, 1]} : vector<1x64xf32> to vector<1x32xf32>
    %108 = vector.extract_strided_slice %5 {offsets = [4, 64], sizes = [1, 32], strides = [1, 1]} : vector<8x96xf32> to vector<1x32xf32>
    %109 = vector.extract_strided_slice %97 {offsets = [0, 64], sizes = [1, 32], strides = [1, 1]} : vector<1x96xf32> to vector<1x32xf32>
    %110 = arith.addf %109, %7 : vector<1x32xf32>
    %111 = arith.mulf %106, %110 : vector<1x32xf32>
    %112 = arith.addf %108, %111 : vector<1x32xf32>
    %113 = math.tanh %112 : vector<1x32xf32>
    %cst_24 = arith.constant 1.000000e+00 : f32
    %114 = vector.broadcast %cst_24 : f32 to vector<1x32xf32>
    %115 = arith.subf %114, %107 : vector<1x32xf32>
    %116 = arith.mulf %115, %113 : vector<1x32xf32>
    %117 = arith.mulf %107, %96 : vector<1x32xf32>
    %118 = arith.addf %116, %117 : vector<1x32xf32>
    %cst_25 = arith.constant dense<0.000000e+00> : vector<1x96xf32>
    %119 = tpu.matmul %118, %6, %cst_25 {dimension_numbers = #tpu.dot_dimension_numbers<[1], [0], [0], [1], [0, 0, 1, 1], [], []>} : vector<1x32xf32>, vector<32x96xf32>, vector<1x96xf32> -> vector<1x96xf32>
    %120 = vector.extract_strided_slice %5 {offsets = [5, 0], sizes = [1, 64], strides = [1, 1]} : vector<8x96xf32> to vector<1x64xf32>
    %121 = vector.extract_strided_slice %119 {offsets = [0, 0], sizes = [1, 64], strides = [1, 1]} : vector<1x96xf32> to vector<1x64xf32>
    %122 = arith.addf %120, %121 : vector<1x64xf32>
    %123 = arith.negf %122 : vector<1x64xf32>
    %124 = math.exp %123 : vector<1x64xf32>
    %cst_26 = arith.constant 1.000000e+00 : f32
    %125 = vector.broadcast %cst_26 : f32 to vector<1x64xf32>
    %126 = arith.addf %125, %124 : vector<1x64xf32>
    %127 = arith.divf %125, %126 : vector<1x64xf32>
    %128 = vector.extract_strided_slice %127 {offsets = [0, 0], sizes = [1, 32], strides = [1, 1]} : vector<1x64xf32> to vector<1x32xf32>
    %129 = vector.extract_strided_slice %127 {offsets = [0, 32], sizes = [1, 32], strides = [1, 1]} : vector<1x64xf32> to vector<1x32xf32>
    %130 = vector.extract_strided_slice %5 {offsets = [5, 64], sizes = [1, 32], strides = [1, 1]} : vector<8x96xf32> to vector<1x32xf32>
    %131 = vector.extract_strided_slice %119 {offsets = [0, 64], sizes = [1, 32], strides = [1, 1]} : vector<1x96xf32> to vector<1x32xf32>
    %132 = arith.addf %131, %7 : vector<1x32xf32>
    %133 = arith.mulf %128, %132 : vector<1x32xf32>
    %134 = arith.addf %130, %133 : vector<1x32xf32>
    %135 = math.tanh %134 : vector<1x32xf32>
    %cst_27 = arith.constant 1.000000e+00 : f32
    %136 = vector.broadcast %cst_27 : f32 to vector<1x32xf32>
    %137 = arith.subf %136, %129 : vector<1x32xf32>
    %138 = arith.mulf %137, %135 : vector<1x32xf32>
    %139 = arith.mulf %129, %118 : vector<1x32xf32>
    %140 = arith.addf %138, %139 : vector<1x32xf32>
    %cst_28 = arith.constant dense<0.000000e+00> : vector<1x96xf32>
    %141 = tpu.matmul %140, %6, %cst_28 {dimension_numbers = #tpu.dot_dimension_numbers<[1], [0], [0], [1], [0, 0, 1, 1], [], []>} : vector<1x32xf32>, vector<32x96xf32>, vector<1x96xf32> -> vector<1x96xf32>
    %142 = vector.extract_strided_slice %5 {offsets = [6, 0], sizes = [1, 64], strides = [1, 1]} : vector<8x96xf32> to vector<1x64xf32>
    %143 = vector.extract_strided_slice %141 {offsets = [0, 0], sizes = [1, 64], strides = [1, 1]} : vector<1x96xf32> to vector<1x64xf32>
    %144 = arith.addf %142, %143 : vector<1x64xf32>
    %145 = arith.negf %144 : vector<1x64xf32>
    %146 = math.exp %145 : vector<1x64xf32>
    %cst_29 = arith.constant 1.000000e+00 : f32
    %147 = vector.broadcast %cst_29 : f32 to vector<1x64xf32>
    %148 = arith.addf %147, %146 : vector<1x64xf32>
    %149 = arith.divf %147, %148 : vector<1x64xf32>
    %150 = vector.extract_strided_slice %149 {offsets = [0, 0], sizes = [1, 32], strides = [1, 1]} : vector<1x64xf32> to vector<1x32xf32>
    %151 = vector.extract_strided_slice %149 {offsets = [0, 32], sizes = [1, 32], strides = [1, 1]} : vector<1x64xf32> to vector<1x32xf32>
    %152 = vector.extract_strided_slice %5 {offsets = [6, 64], sizes = [1, 32], strides = [1, 1]} : vector<8x96xf32> to vector<1x32xf32>
    %153 = vector.extract_strided_slice %141 {offsets = [0, 64], sizes = [1, 32], strides = [1, 1]} : vector<1x96xf32> to vector<1x32xf32>
    %154 = arith.addf %153, %7 : vector<1x32xf32>
    %155 = arith.mulf %150, %154 : vector<1x32xf32>
    %156 = arith.addf %152, %155 : vector<1x32xf32>
    %157 = math.tanh %156 : vector<1x32xf32>
    %cst_30 = arith.constant 1.000000e+00 : f32
    %158 = vector.broadcast %cst_30 : f32 to vector<1x32xf32>
    %159 = arith.subf %158, %151 : vector<1x32xf32>
    %160 = arith.mulf %159, %157 : vector<1x32xf32>
    %161 = arith.mulf %151, %140 : vector<1x32xf32>
    %162 = arith.addf %160, %161 : vector<1x32xf32>
    %cst_31 = arith.constant dense<0.000000e+00> : vector<1x96xf32>
    %163 = tpu.matmul %162, %6, %cst_31 {dimension_numbers = #tpu.dot_dimension_numbers<[1], [0], [0], [1], [0, 0, 1, 1], [], []>} : vector<1x32xf32>, vector<32x96xf32>, vector<1x96xf32> -> vector<1x96xf32>
    %164 = vector.extract_strided_slice %5 {offsets = [7, 0], sizes = [1, 64], strides = [1, 1]} : vector<8x96xf32> to vector<1x64xf32>
    %165 = vector.extract_strided_slice %163 {offsets = [0, 0], sizes = [1, 64], strides = [1, 1]} : vector<1x96xf32> to vector<1x64xf32>
    %166 = arith.addf %164, %165 : vector<1x64xf32>
    %167 = arith.negf %166 : vector<1x64xf32>
    %168 = math.exp %167 : vector<1x64xf32>
    %cst_32 = arith.constant 1.000000e+00 : f32
    %169 = vector.broadcast %cst_32 : f32 to vector<1x64xf32>
    %170 = arith.addf %169, %168 : vector<1x64xf32>
    %171 = arith.divf %169, %170 : vector<1x64xf32>
    %172 = vector.extract_strided_slice %171 {offsets = [0, 0], sizes = [1, 32], strides = [1, 1]} : vector<1x64xf32> to vector<1x32xf32>
    %173 = vector.extract_strided_slice %171 {offsets = [0, 32], sizes = [1, 32], strides = [1, 1]} : vector<1x64xf32> to vector<1x32xf32>
    %174 = vector.extract_strided_slice %5 {offsets = [7, 64], sizes = [1, 32], strides = [1, 1]} : vector<8x96xf32> to vector<1x32xf32>
    %175 = vector.extract_strided_slice %163 {offsets = [0, 64], sizes = [1, 32], strides = [1, 1]} : vector<1x96xf32> to vector<1x32xf32>
    %176 = arith.addf %175, %7 : vector<1x32xf32>
    %177 = arith.mulf %172, %176 : vector<1x32xf32>
    %178 = arith.addf %174, %177 : vector<1x32xf32>
    %179 = math.tanh %178 : vector<1x32xf32>
    %cst_33 = arith.constant 1.000000e+00 : f32
    %180 = vector.broadcast %cst_33 : f32 to vector<1x32xf32>
    %181 = arith.subf %180, %173 : vector<1x32xf32>
    %182 = arith.mulf %181, %179 : vector<1x32xf32>
    %183 = arith.mulf %173, %162 : vector<1x32xf32>
    %184 = arith.addf %182, %183 : vector<1x32xf32>
    %185 = math.absf %184 : vector<1x32xf32>
    %c0_34 = arith.constant 0 : index
    %c0_35 = arith.constant 0 : index
    %186 = vector.load %arg5[%c0_34, %c0_35] : memref<1x32xf32, #tpu.memory_space<vmem>>, vector<1x32xf32>
    tpu.vector_store %arg5[%c0_34, %c0_35], %185 {strides = array<i32>} : memref<1x32xf32, #tpu.memory_space<vmem>>, vector<1x32xf32>,
    return
  }
}

</mosaic_0001>

<bundles_post_ra>
// kernel: tpu_custom_call.1
= control target key start
LH: loop header
LB: loop body
LE: loop exit
PB: predicated region body
PF: predicated region fallthrough
CT: control target
= control target key end

     0   :  { %10 = vsyncpa [#allocation3], 0  ;;  %s1640_s0 = inlined_call_operand.hbm [shape: f32[8,32], index: 0, kind: input, shape index: {}]   ;;  %s1641_s1 = inlined_call_operand.hbm [shape: f32[32,96], index: 1, kind: input, shape index: {}]   ;;  %s1642_s2 = inlined_call_operand.vmem [shape: f32[1,96], index: 2, kind: input, shape index: {}]   ;;  %s1643_s3 = inlined_call_operand.hbm [shape: f32[32,96], index: 3, kind: input, shape index: {}]   ;;  %s1644_s4 = inlined_call_operand.vmem [shape: f32[1,32], index: 4, kind: input, shape index: {}]   ;;  %s1645_s5 = inlined_call_operand.hbm [shape: f32[1,32], index: 5, kind: output, shape index: {}]  }
   0x1   :  { %11 = vsyncpa [#allocation6], 0 }
   0x2   :  { %12 = vsyncpa [#allocation4], 0  ;;  %s1413_s18 = smov [#allocation5]   ;;  %s1319_s22 = scalar_lea.hbm %s1641_s1, 512 }
   0x3   :  { %s28_s19 = sshll.u32 %s1413_s18, 4  ;;  %p1320_p0 = scmp.ne.s32.totalorder %s1641_s1, %s1319_s22  ;;  %s29_s19 = int_to_ptr.vmem [resolvable:$true] %s28_s19 }
   0x4   :  { %p1323_p1 = scmp.lt.u32.totalorder %s1319_s22, %s1641_s1 }
   0x6   :  { %p1325_p2 = pnand %p1323_p1, %p1320_p0 }
   0x8   :  { %1328 = shalt.err (!%p1325_p2)
}
   0x9   :  { %s1329_s27 = scalar_lea.vmem %s29_s19, 512  ;;  %p1334_p4 = scmp.lt.s32.totalorder %s29_s19, %s29_s19 }
   0xa   :  { %p1330_p3 = scmp.ne.s32.totalorder %s29_s19, %s1329_s27  ;;  %p1335_p5 = scmp.lt.s32.totalorder %s1329_s27, %s1329_s27 }
   0xc   :  { %p1336_p6 = por %p1335_p5, %p1334_p4 }
   0xe   :  { %p1337_p7 = pnand %p1336_p6, %p1330_p3 }
  0x10   :  { %1340 = shalt.err (!%p1337_p7)
}
  0x11   :  { %s1414_s28 = smov 128   ;;  %s1415_s29 = smov 8  }
  0x12   :  { %34 = dma.hbm_to_vmem [thread:$0]  %s1641_s1, 512, %s29_s19, [#allocation6], %s1414_s28, %s1414_s28, %s1415_s29  }
  0x13   :  { %s1416_s7 = smov [#allocation2]   ;;  %s1417_s9 = smov [#allocation7]  }
  0x14   :  { %s19_s8 = sshll.u32 %s1416_s7, 4  ;;  %s42_s10 = sshll.u32 %s1417_s9, 4  ;;  %s20_s8 = int_to_ptr.vmem [resolvable:$true] %s19_s8  ;;  %s43_s10 = int_to_ptr.vmem [resolvable:$true] %s42_s10 }
  0x15   :  { %s1341_s13 = scalar_lea.hbm %s1640_s0, 128 }
  0x16   :  { %p1342_p8 = scmp.ne.s32.totalorder %s1640_s0, %s1341_s13  ;;  %p1345_p9 = scmp.lt.u32.totalorder %s1341_s13, %s1640_s0 }
  0x18   :  { %p1347_p10 = pnand %p1345_p9, %p1342_p8 }
  0x1a   :  { %1350 = shalt.err (!%p1347_p10)
}
  0x1b   :  { %s1351_s1 = scalar_lea.vmem %s20_s8, 128  ;;  %p1356_p12 = scmp.lt.s32.totalorder %s20_s8, %s20_s8 }
  0x1c   :  { %p1352_p11 = scmp.ne.s32.totalorder %s20_s8, %s1351_s1  ;;  %p1357_p13 = scmp.lt.s32.totalorder %s1351_s1, %s1351_s1 }
  0x1e   :  { %p1358_p0 = por %p1357_p13, %p1356_p12 }
  0x20   :  { %p1359_p1 = pnand %p1358_p0, %p1352_p11 }
  0x22   :  { %1362 = shalt.err (!%p1359_p1)
}
  0x23   :  { %22 = dma.hbm_to_vmem [thread:$0]  %s1640_s0, 128, %s20_s8, [#allocation3]  }
  0x24   :  { %s1363_s22 = scalar_lea.hbm %s1643_s3, 512 }
  0x25   :  { %p1364_p2 = scmp.ne.s32.totalorder %s1643_s3, %s1363_s22  ;;  %p1367_p3 = scmp.lt.u32.totalorder %s1363_s22, %s1643_s3 }
  0x27   :  { %p1369_p4 = pnand %p1367_p3, %p1364_p2 }
  0x29   :  { %1372 = shalt.err (!%p1369_p4)
}
  0x2a   :  { %s1373_s27 = scalar_lea.vmem %s43_s10, 512  ;;  %p1378_p6 = scmp.lt.s32.totalorder %s43_s10, %s43_s10 }
  0x2b   :  { %p1374_p5 = scmp.ne.s32.totalorder %s43_s10, %s1373_s27  ;;  %p1379_p7 = scmp.lt.s32.totalorder %s1373_s27, %s1373_s27 }
  0x2d   :  { %p1380_p8 = por %p1379_p7, %p1378_p6 }
  0x2f   :  { %p1381_p9 = pnand %p1380_p8, %p1374_p5 }
  0x31   :  { %1384 = shalt.err (!%p1381_p9)
}
  0x32   :  { %48 = dma.hbm_to_vmem [thread:$0]  %s1643_s3, 512, %s43_s10, [#allocation6], %s1414_s28, %s1414_s28, %s1415_s29  }
  0x33   :  { %1407 = dma.done.wait [#allocation3], 128  }
  0x34   :  { %1408 = vsyncadd [#allocation3], 4294967168 }
  0x35   :  { %1409 = dma.done.wait [#allocation6], 1024  }
  0x36   :  { %1410 = vsyncadd [#allocation6], 4294966272  ;;  %v1418_v0 = vmov 0.0|0.0   ;;  %vm1419_vm0 = vmmov 0   ;;  %v1420_v1 = vmov 0.0   ;;  %v61_v2 = vld [vmem:[#allocation5] sm:$0xff] }
  0x37   :  { %1206 = vmatprep.subr.bf16.mxu0 %v1418_v0  ;;  %1212 = vmatprep.subr.bf16.mxu1 %v1418_v0  ;;  %v62_v3 = vld [vmem:[#allocation5 + $0x8] sm:$0xff]  ;;  %v146_v4 = vld [vmem:[#allocation7] sm:$0xff]  ;;  %v63_v7 = vld [vmem:[#allocation5 + $0x10] sm:$0xff]  ;;  %s1421_s29 = smov 64   ;;  %vm72_vm1 = vcmask 261120   ;;  %s1423_s7 = smov [#allocation8]  }
  0x38   :  { %1115 = vmatprep.mubr.msk.f32.mxu0 %vm1419_vm0, %v1420_v1  ;;  %1126 = vmatprep.mubr.msk.f32.mxu1 %vm1419_vm0, %v1420_v1  ;;  %v1207_v5 = vpack.c.bf16 %v62_v3, %v61_v2  ;;  %v147_v6 = vld [vmem:[#allocation7 + $0x8] sm:$0xff]  ;;  %v64_v8 = vld [vmem:[#allocation5 + $0x18] sm:$0xff]  ;;  %v148_v10 = vld [vmem:[#allocation7 + $0x10] sm:$0xff]  ;;  %s1034_s8 = sshll.u32 %s1423_s7, 4  ;;  %vm1026_vm2 = vcmask 261127   ;;  %s1035_s8 = int_to_ptr.vmem [resolvable:$true] %s1034_s8 }
  0x39   :  { %v1502_v9 = vpack.c.bf16 %v147_v6, %v146_v4  ;;  %v149_v11 = vld [vmem:[#allocation7 + $0x18] sm:$0xff]  ;;  %v1210_v12 = vpack.c.bf16 %v64_v8, %v63_v7  ;;  %s1385_s9 = scalar_lea.vmem %s1035_s8, 16  ;;  %s1389_s10 = scalar_lea.vmem %s1035_s8, 32 }
  0x3a   :  { %1208 = vmatpush3.bf16.msra.mxu0 %v1207_v5  ;;  %v1047_v13 = vld [vmem:[%s1644_s4] ss:$0 sm:$0xff]  ;;  %v1509_v14 = vpack.c.bf16 %v149_v11, %v148_v10  ;;  %p1386_p10 = scmp.ne.s32.totalorder %s1035_s8, %s1385_s9  ;;  %p1390_p11 = scmp.lt.s32.totalorder %s1035_s8, %s1035_s8 }
  0x3b   :  { %1214 = vmatpush3.bf16.msra.mxu1 %v1502_v9  ;;  %1209 = vmatprep.subr.bf16.mxu0 %v1418_v0  ;;  %v60_v15 = vld [vmem:[#allocation2] sm:$0xff]  ;;  %p1391_p12 = scmp.lt.s32.totalorder %s1389_s10, %s1385_s9 }
  0x3c   :  { %1215 = vmatprep.subr.bf16.mxu1 %v1418_v0  ;;  %236 = vrot.lane.b32.xlu0 %v1047_v13, %s1421_s29  ;;  %v1044_v22 = vld [vmem:[%s1642_s2] ss:$0 sm:$0xff]  ;;  %s1422_s2 = smov 96  }
  0x3d   :  { %p1392_p13 = por %p1391_p12, %p1390_p11 }
  0x3e   :  { %1211 = vmatpush3.bf16.msra.mxu0 %v1210_v12 }
  0x3f   :  { %1217 = vmatpush3.bf16.msra.mxu1 %v1509_v14  ;;  %1218 = vmatprep.subr.bf16.mxu0 %v1418_v0  ;;  %p1393_p0 = pnand %p1392_p13, %p1386_p10 }
  0x40   :  { %1224 = vmatprep.subr.bf16.mxu1 %v1418_v0 }
  0x41   :  { %1116 = vmatmul.mubr.msk.f32.vlgmr.msra.gmra.mrb[0].mxu0 %vm72_vm1, %v60_v15 }
  0x42   :  { %1127 = vmatmul.mubr.f32.vlgmr.msra.gmra.mrb[0].mxu1 %v1420_v1  ;;  %1220 = vmatpush3.bf16.msra.mxu0 %v1502_v9 }
  0x43   :  { %1221 = vmatprep.subr.bf16.mxu0 %v1418_v0  ;;  %1137 = vmatprep.mubr.msk.f32.mxu0 %vm1419_vm0, %v1420_v1 }
  0x44   :  { %1226 = vmatpush3.bf16.msra.mxu1 %v1502_v9  ;;  %1148 = vmatprep.mubr.msk.f32.mxu1 %vm1419_vm0, %v1420_v1 }
  0x45   :  { %1227 = vmatprep.subr.bf16.mxu1 %v1418_v0 }
  0x46   :  { %1223 = vmatpush3.bf16.msra.mxu0 %v1509_v14 }
  0x47   :  { %1230 = vmatprep.subr.bf16.mxu0 %v1418_v0 }
  0x48   :  { %1229 = vmatpush3.bf16.msra.mxu1 %v1509_v14 }
  0x49   :  { %1236 = vmatprep.subr.bf16.mxu1 %v1418_v0 }
  0xae   :  { %v1530_v16 = vpop.permute.xlu0 %236 }
 0x114   :  { %v142_v17 = vpop.f32.mrb[0].mxu0 }
 0x115   :  { %v220_v18 = vpop.f32.mrb[0].mxu1  ;;  %v1117_v19 = vpop.f32.mrb[1].mxu0  ;;  %v1537_v23 = vadd.f32 %v1044_v22, %v142_v17 }
 0x116   :  { %v239_v20 = vadd.f32 %v1530_v16, %v220_v18  ;;  %v1128_v21 = vpop.f32.mrb[1].mxu1 }
 0x117   :  { %v224_v24 = vadd.f32 %v220_v18, %v1537_v23 }
 0x118   :  { %241 = vrot.lane.b32.xlu0 %v239_v20, %s1421_s29 }
 0x119   :  { %v1046_v25 = vmul.f32 -1.442695, %v224_v24 }
 0x11b   :  { %1271 = vpow2.f32 %v1046_v25 }
 0x125   :  { %v1272_v26 = vpop.eup %1271 }
 0x126   :  { %v228_v27 = vadd.f32 1.0, %v1272_v26 }
 0x128   :  { %1273 = vrcp.f32 %v228_v27 }
 0x132   :  { %v1274_v28 = vpop.eup %1273 }
 0x133   :  { %v251_v34 = vsub.f32 1.0, %v1274_v28  ;;  %v257_v36 = vmul.f32 0.0, %v1274_v28 }
 0x18a   :  { %v242_v29 = vpop.permute.xlu0 %241 }
 0x18b   :  { %v244_v30 = vmul.f32 %v1274_v28, %v242_v29 }
 0x18d   :  { %246 = vrot.lane.b32.xlu1 %v244_v30, %s1421_s29 }
 0x1ff   :  { %v247_v31 = vpop.permute.xlu1 %246 }
 0x200   :  { %v249_v32 = vadd.f32 %v247_v31, %v1537_v23 }
 0x202   :  { %1275 = vtanh.f32 %v249_v32 }
 0x20c   :  { %v1276_v33 = vpop.eup %1275 }
 0x20d   :  { %253 = vrot.lane.b32.xlu1 %v1276_v33, %s1422_s2 }
 0x27f   :  { %v254_v35 = vpop.permute.xlu1 %253 }
 0x280   :  { %v256_v37 = vmul.f32 %v254_v35, %v251_v34 }
 0x282   :  { %v258_v38 = vadd.f32 %v257_v36, %v256_v37 }
 0x284   :  { %260 = vrot.lane.b32.xlu0 %v258_v38, %s1422_s2  ;;  %v363_v55 = vrot.slane %v258_v38, 7 }
 0x2f6   :  { %v261_v39 = vpop.permute.xlu0 %260 }
 0x2f7   :  { %1138 = vmatmul.mubr.msk.f32.vlgmr.msra.gmra.mrb[2].mxu0 %vm72_vm1, %v261_v39 }
 0x2f8   :  { %1232 = vmatpush3.bf16.msra.mxu0 %v1502_v9  ;;  %1159 = vmatprep.mubr.msk.f32.mxu0 %vm1419_vm0, %v1420_v1 }
 0x2f9   :  { %1233 = vmatprep.subr.bf16.mxu0 %v1418_v0 }
 0x2fc   :  { %1235 = vmatpush3.bf16.msra.mxu0 %v1509_v14 }
 0x2fd   :  { %1242 = vmatprep.subr.bf16.mxu0 %v1418_v0 }
 0x3ca   :  { %v330_v40 = vpop.f32.mrb[2].mxu0 }
 0x3cb   :  { %v344_v41 = vadd.f32 %v330_v40, %v1530_v16  ;;  %v1139_v42 = vpop.f32.mrb[3].mxu0  ;;  %v335_v44 = vrot.slane %v330_v40, 7 }
 0x3cd   :  { %v346_v43 = vrot.slane %v344_v41, 7  ;;  %v337_v45 = vadd.f32 %v335_v44, %v1537_v23 }
 0x3cf   :  { %347 = vrot.lane.b32.xlu1 %v346_v43, %s1421_s29  ;;  %v1049_v46 = vmul.f32 -1.442695, %v337_v45 }
 0x3d1   :  { %1277 = vpow2.f32 %v1049_v46 }
 0x3db   :  { %v1278_v47 = vpop.eup %1277 }
 0x3dc   :  { %v341_v48 = vadd.f32 1.0, %v1278_v47 }
 0x3de   :  { %1279 = vrcp.f32 %v341_v48 }
 0x3e8   :  { %v1280_v49 = vpop.eup %1279 }
 0x3e9   :  { %v357_v56 = vsub.f32 1.0, %v1280_v49  ;;  %v365_v58 = vmul.f32 %v1280_v49, %v363_v55 }
 0x441   :  { %v348_v50 = vpop.permute.xlu1 %347 }
 0x442   :  { %v350_v51 = vmul.f32 %v1280_v49, %v348_v50 }
 0x444   :  { %352 = vrot.lane.b32.xlu0 %v350_v51, %s1421_s29 }
 0x4b6   :  { %v353_v52 = vpop.permute.xlu0 %352 }
 0x4b7   :  { %v355_v53 = vadd.f32 %v353_v52, %v1537_v23 }
 0x4b9   :  { %1281 = vtanh.f32 %v355_v53 }
 0x4c3   :  { %v1282_v54 = vpop.eup %1281 }
 0x4c4   :  { %359 = vrot.lane.b32.xlu1 %v1282_v54, %s1422_s2 }
 0x536   :  { %v360_v57 = vpop.permute.xlu1 %359 }
 0x537   :  { %v362_v59 = vmul.f32 %v360_v57, %v357_v56 }
 0x539   :  { %v366_v60 = vadd.f32 %v365_v58, %v362_v59 }
 0x53b   :  { %v368_v61 = vrot.slane %v366_v60, 1  ;;  %v472_v19 = vrot.slane %v366_v60, 7 }
 0x53d   :  { %369 = vrot.lane.b32.xlu0 %v368_v61, %s1422_s2 }
 0x5af   :  { %v370_v62 = vpop.permute.xlu0 %369 }
 0x5b0   :  { %1149 = vmatmul.mubr.msk.f32.vlgmr.msra.gmra.mrb[2].mxu1 %vm72_vm1, %v370_v62 }
 0x5b1   :  { %1238 = vmatpush3.bf16.msra.mxu1 %v1502_v9  ;;  %1170 = vmatprep.mubr.msk.f32.mxu1 %vm1419_vm0, %v1420_v1 }
 0x5b2   :  { %1239 = vmatprep.subr.bf16.mxu1 %v1418_v0 }
 0x5b5   :  { %1241 = vmatpush3.bf16.msra.mxu1 %v1509_v14 }
 0x5b6   :  { %1248 = vmatprep.subr.bf16.mxu1 %v1418_v0 }
 0x683   :  { %v439_v63 = vpop.f32.mrb[2].mxu1 }
 0x684   :  { %v453_v2 = vadd.f32 %v439_v63, %v1530_v16  ;;  %v1150_v3 = vpop.f32.mrb[3].mxu1  ;;  %v444_v5 = vrot.slane %v439_v63, 6 }
 0x686   :  { %v455_v4 = vrot.slane %v453_v2, 6  ;;  %v446_v6 = vadd.f32 %v444_v5, %v1537_v23 }
 0x688   :  { %456 = vrot.lane.b32.xlu1 %v455_v4, %s1421_s29  ;;  %v1051_v7 = vmul.f32 -1.442695, %v446_v6 }
 0x68a   :  { %1283 = vpow2.f32 %v1051_v7 }
 0x694   :  { %v1284_v8 = vpop.eup %1283 }
 0x695   :  { %v450_v10 = vadd.f32 1.0, %v1284_v8 }
 0x697   :  { %1285 = vrcp.f32 %v450_v10 }
 0x6a1   :  { %v1286_v11 = vpop.eup %1285 }
 0x6a2   :  { %v466_v20 = vsub.f32 1.0, %v1286_v11  ;;  %v474_v22 = vmul.f32 %v1286_v11, %v472_v19 }
 0x6fa   :  { %v457_v12 = vpop.permute.xlu1 %456 }
 0x6fb   :  { %v459_v13 = vmul.f32 %v1286_v11, %v457_v12 }
 0x6fd   :  { %461 = vrot.lane.b32.xlu0 %v459_v13, %s1421_s29 }
 0x76f   :  { %v462_v15 = vpop.permute.xlu0 %461 }
 0x770   :  { %v464_v17 = vadd.f32 %v462_v15, %v1537_v23 }
 0x772   :  { %1287 = vtanh.f32 %v464_v17 }
 0x77c   :  { %v1288_v18 = vpop.eup %1287 }
 0x77d   :  { %468 = vrot.lane.b32.xlu1 %v1288_v18, %s1422_s2 }
 0x7ef   :  { %v469_v21 = vpop.permute.xlu1 %468 }
 0x7f0   :  { %v471_v24 = vmul.f32 %v469_v21, %v466_v20 }
 0x7f2   :  { %v475_v25 = vadd.f32 %v474_v22, %v471_v24 }
 0x7f4   :  { %v477_v26 = vrot.slane %v475_v25, 2  ;;  %v581_v43 = vrot.slane %v475_v25, 7 }
 0x7f6   :  { %478 = vrot.lane.b32.xlu0 %v477_v26, %s1422_s2 }
 0x868   :  { %v479_v27 = vpop.permute.xlu0 %478 }
 0x869   :  { %1160 = vmatmul.mubr.msk.f32.vlgmr.msra.gmra.mrb[4].mxu0 %vm72_vm1, %v479_v27 }
 0x86a   :  { %1244 = vmatpush3.bf16.msra.mxu0 %v1502_v9  ;;  %1181 = vmatprep.mubr.msk.f32.mxu0 %vm1419_vm0, %v1420_v1 }
 0x86b   :  { %1245 = vmatprep.subr.bf16.mxu0 %v1418_v0 }
 0x86e   :  { %1247 = vmatpush3.bf16.msra.mxu0 %v1509_v14 }
 0x86f   :  { %1254 = vmatprep.subr.bf16.mxu0 %v1418_v0 }
 0x93c   :  { %v548_v28 = vpop.f32.mrb[4].mxu0 }
 0x93d   :  { %v562_v29 = vadd.f32 %v548_v28, %v1530_v16  ;;  %v1161_v30 = vpop.f32.mrb[5].mxu0  ;;  %v553_v32 = vrot.slane %v548_v28, 5 }
 0x93f   :  { %v564_v31 = vrot.slane %v562_v29, 5  ;;  %v555_v33 = vadd.f32 %v553_v32, %v1537_v23 }
 0x941   :  { %565 = vrot.lane.b32.xlu1 %v564_v31, %s1421_s29  ;;  %v1053_v34 = vmul.f32 -1.442695, %v555_v33 }
 0x943   :  { %1289 = vpow2.f32 %v1053_v34 }
 0x94d   :  { %v1290_v35 = vpop.eup %1289 }
 0x94e   :  { %v559_v36 = vadd.f32 1.0, %v1290_v35 }
 0x950   :  { %1291 = vrcp.f32 %v559_v36 }
 0x95a   :  { %v1292_v37 = vpop.eup %1291 }
 0x95b   :  { %v575_v44 = vsub.f32 1.0, %v1292_v37  ;;  %v583_v46 = vmul.f32 %v1292_v37, %v581_v43 }
 0x9b3   :  { %v566_v38 = vpop.permute.xlu1 %565 }
 0x9b4   :  { %v568_v39 = vmul.f32 %v1292_v37, %v566_v38 }
 0x9b6   :  { %570 = vrot.lane.b32.xlu0 %v568_v39, %s1421_s29 }
 0xa28   :  { %v571_v40 = vpop.permute.xlu0 %570 }
 0xa29   :  { %v573_v41 = vadd.f32 %v571_v40, %v1537_v23 }
 0xa2b   :  { %1293 = vtanh.f32 %v573_v41 }
 0xa35   :  { %v1294_v42 = vpop.eup %1293 }
 0xa36   :  { %577 = vrot.lane.b32.xlu1 %v1294_v42, %s1422_s2 }
 0xaa8   :  { %v578_v45 = vpop.permute.xlu1 %577 }
 0xaa9   :  { %v580_v47 = vmul.f32 %v578_v45, %v575_v44 }
 0xaab   :  { %v584_v48 = vadd.f32 %v583_v46, %v580_v47 }
 0xaad   :  { %v586_v49 = vrot.slane %v584_v48, 3  ;;  %v690_v4 = vrot.slane %v584_v48, 7 }
 0xaaf   :  { %587 = vrot.lane.b32.xlu0 %v586_v49, %s1422_s2 }
 0xb21   :  { %v588_v50 = vpop.permute.xlu0 %587 }
 0xb22   :  { %1171 = vmatmul.mubr.msk.f32.vlgmr.msra.gmra.mrb[4].mxu1 %vm72_vm1, %v588_v50 }
 0xb23   :  { %1250 = vmatpush3.bf16.msra.mxu1 %v1502_v9  ;;  %1192 = vmatprep.mubr.msk.f32.mxu1 %vm1419_vm0, %v1420_v1 }
 0xb24   :  { %1251 = vmatprep.subr.bf16.mxu1 %v1418_v0 }
 0xb27   :  { %1253 = vmatpush3.bf16.msra.mxu1 %v1509_v14 }
 0xbf5   :  { %v657_v51 = vpop.f32.mrb[4].mxu1 }
 0xbf6   :  { %v671_v52 = vadd.f32 %v657_v51, %v1530_v16  ;;  %v1172_v53 = vpop.f32.mrb[5].mxu1  ;;  %v662_v55 = vrot.slane %v657_v51, 4 }
 0xbf8   :  { %v673_v54 = vrot.slane %v671_v52, 4  ;;  %v664_v56 = vadd.f32 %v662_v55, %v1537_v23 }
 0xbfa   :  { %674 = vrot.lane.b32.xlu1 %v673_v54, %s1421_s29  ;;  %v1055_v57 = vmul.f32 -1.442695, %v664_v56 }
 0xbfc   :  { %1295 = vpow2.f32 %v1055_v57 }
 0xc06   :  { %v1296_v58 = vpop.eup %1295 }
 0xc07   :  { %v668_v59 = vadd.f32 1.0, %v1296_v58 }
 0xc09   :  { %1297 = vrcp.f32 %v668_v59 }
 0xc13   :  { %v1298_v60 = vpop.eup %1297 }
 0xc14   :  { %v684_v5 = vsub.f32 1.0, %v1298_v60  ;;  %v692_v7 = vmul.f32 %v1298_v60, %v690_v4 }
 0xc6c   :  { %v675_v61 = vpop.permute.xlu1 %674 }
 0xc6d   :  { %v677_v62 = vmul.f32 %v1298_v60, %v675_v61 }
 0xc6f   :  { %679 = vrot.lane.b32.xlu0 %v677_v62, %s1421_s29 }
 0xce1   :  { %v680_v63 = vpop.permute.xlu0 %679 }
 0xce2   :  { %v682_v2 = vadd.f32 %v680_v63, %v1537_v23 }
 0xce4   :  { %1299 = vtanh.f32 %v682_v2 }
 0xcee   :  { %v1300_v3 = vpop.eup %1299 }
 0xcef   :  { %686 = vrot.lane.b32.xlu1 %v1300_v3, %s1422_s2 }
 0xd61   :  { %v687_v6 = vpop.permute.xlu1 %686 }
 0xd62   :  { %v689_v8 = vmul.f32 %v687_v6, %v684_v5 }
 0xd64   :  { %v693_v10 = vadd.f32 %v692_v7, %v689_v8 }
 0xd66   :  { %v695_v11 = vrot.slane %v693_v10, 4  ;;  %v799_v27 = vrot.slane %v693_v10, 7 }
 0xd68   :  { %696 = vrot.lane.b32.xlu0 %v695_v11, %s1422_s2 }
 0xdda   :  { %v697_v12 = vpop.permute.xlu0 %696 }
 0xddb   :  { %1182 = vmatmul.mubr.msk.f32.vlgmr.msra.gmra.mrb[6].mxu0 %vm72_vm1, %v697_v12 }
 0xddc   :  { %1256 = vmatpush3.bf16.msra.mxu0 %v1502_v9  ;;  %1203 = vmatprep.mubr.msk.f32.mxu0 %vm1419_vm0, %v1420_v1 }
 0xddd   :  { %1257 = vmatprep.subr.bf16.mxu0 %v1418_v0 }
 0xde0   :  { %1259 = vmatpush3.bf16.msra.mxu0 %v1509_v14 }
 0xeae   :  { %v766_v13 = vpop.f32.mrb[6].mxu0 }
 0xeaf   :  { %v780_v15 = vadd.f32 %v766_v13, %v1530_v16  ;;  %v1183_v17 = vpop.f32.mrb[7].mxu0  ;;  %v771_v19 = vrot.slane %v766_v13, 3 }
 0xeb1   :  { %v782_v18 = vrot.slane %v780_v15, 3  ;;  %v773_v20 = vadd.f32 %v771_v19, %v1537_v23 }
 0xeb3   :  { %783 = vrot.lane.b32.xlu1 %v782_v18, %s1421_s29  ;;  %v1057_v21 = vmul.f32 -1.442695, %v773_v20 }
 0xeb5   :  { %1301 = vpow2.f32 %v1057_v21 }
 0xebf   :  { %v1302_v9 = vpop.eup %1301 }
 0xec0   :  { %v777_v22 = vadd.f32 1.0, %v1302_v9 }
 0xec2   :  { %1303 = vrcp.f32 %v777_v22 }
 0xecc   :  { %v1304_v1 = vpop.eup %1303 }
 0xecd   :  { %v793_v28 = vsub.f32 1.0, %v1304_v1  ;;  %v801_v30 = vmul.f32 %v1304_v1, %v799_v27 }
 0xf25   :  { %v784_v24 = vpop.permute.xlu1 %783 }
 0xf26   :  { %v786_v0 = vmul.f32 %v1304_v1, %v784_v24 }
 0xf28   :  { %788 = vrot.lane.b32.xlu0 %v786_v0, %s1421_s29 }
 0xf9a   :  { %v789_v14 = vpop.permute.xlu0 %788 }
 0xf9b   :  { %v791_v25 = vadd.f32 %v789_v14, %v1537_v23 }
 0xf9d   :  { %1305 = vtanh.f32 %v791_v25 }
 0xfa7   :  { %v1306_v26 = vpop.eup %1305 }
 0xfa8   :  { %795 = vrot.lane.b32.xlu1 %v1306_v26, %s1422_s2 }
0x101a   :  { %v796_v29 = vpop.permute.xlu1 %795 }
0x101b   :  { %v798_v31 = vmul.f32 %v796_v29, %v793_v28 }
0x101d   :  { %v802_v32 = vadd.f32 %v801_v30, %v798_v31 }
0x101f   :  { %v804_v33 = vrot.slane %v802_v32, 5  ;;  %v908_v50 = vrot.slane %v802_v32, 7 }
0x1021   :  { %805 = vrot.lane.b32.xlu0 %v804_v33, %s1422_s2 }
0x1093   :  { %v806_v34 = vpop.permute.xlu0 %805 }
0x1094   :  { %1193 = vmatmul.mubr.msk.f32.vlgmr.msra.gmra.mrb[6].mxu1 %vm72_vm1, %v806_v34 }
0x1167   :  { %v875_v35 = vpop.f32.mrb[6].mxu1 }
0x1168   :  { %v889_v36 = vadd.f32 %v875_v35, %v1530_v16  ;;  %v1194_v37 = vpop.f32.mrb[7].mxu1  ;;  %v880_v39 = vrot.slane %v875_v35, 2 }
0x116a   :  { %v891_v38 = vrot.slane %v889_v36, 2  ;;  %v882_v40 = vadd.f32 %v880_v39, %v1537_v23 }
0x116c   :  { %892 = vrot.lane.b32.xlu1 %v891_v38, %s1421_s29  ;;  %v1059_v41 = vmul.f32 -1.442695, %v882_v40 }
0x116e   :  { %1307 = vpow2.f32 %v1059_v41 }
0x1178   :  { %v1308_v42 = vpop.eup %1307 }
0x1179   :  { %v886_v43 = vadd.f32 1.0, %v1308_v42 }
0x117b   :  { %1309 = vrcp.f32 %v886_v43 }
0x1185   :  { %v1310_v44 = vpop.eup %1309 }
0x1186   :  { %v902_v51 = vsub.f32 1.0, %v1310_v44  ;;  %v910_v53 = vmul.f32 %v1310_v44, %v908_v50 }
0x11de   :  { %v893_v45 = vpop.permute.xlu1 %892 }
0x11df   :  { %v895_v46 = vmul.f32 %v1310_v44, %v893_v45 }
0x11e1   :  { %897 = vrot.lane.b32.xlu0 %v895_v46, %s1421_s29 }
0x1253   :  { %v898_v47 = vpop.permute.xlu0 %897 }
0x1254   :  { %v900_v48 = vadd.f32 %v898_v47, %v1537_v23 }
0x1256   :  { %1311 = vtanh.f32 %v900_v48 }
0x1260   :  { %v1312_v49 = vpop.eup %1311 }
0x1261   :  { %904 = vrot.lane.b32.xlu1 %v1312_v49, %s1422_s2 }
0x12d3   :  { %v905_v52 = vpop.permute.xlu1 %904 }
0x12d4   :  { %v907_v54 = vmul.f32 %v905_v52, %v902_v51 }
0x12d6   :  { %v911_v55 = vadd.f32 %v910_v53, %v907_v54 }
0x12d8   :  { %v913_v56 = vrot.slane %v911_v55, 6  ;;  %v1017_v11 = vrot.slane %v911_v55, 7 }
0x12da   :  { %914 = vrot.lane.b32.xlu0 %v913_v56, %s1422_s2 }
0x134c   :  { %v915_v57 = vpop.permute.xlu0 %914 }
0x134d   :  { %1204 = vmatmul.mubr.msk.f32.vlgmr.msra.gmra.mrb[8].mxu0 %vm72_vm1, %v915_v57 }
0x1420   :  { %v984_v58 = vpop.f32.mrb[8].mxu0 }
0x1421   :  { %v998_v59 = vadd.f32 %v984_v58, %v1530_v16  ;;  %v1205_v60 = vpop.f32.mrb[9].mxu0  ;;  %v989_v62 = vrot.slane %v984_v58, 1 }
0x1423   :  { %v1000_v61 = vrot.slane %v998_v59, 1  ;;  %v991_v63 = vadd.f32 %v989_v62, %v1537_v23 }
0x1425   :  { %1001 = vrot.lane.b32.xlu1 %v1000_v61, %s1421_s29  ;;  %v1061_v2 = vmul.f32 -1.442695, %v991_v63 }
0x1427   :  { %1313 = vpow2.f32 %v1061_v2 }
0x1431   :  { %v1314_v3 = vpop.eup %1313 }
0x1432   :  { %v995_v4 = vadd.f32 1.0, %v1314_v3 }
0x1434   :  { %1315 = vrcp.f32 %v995_v4 }
0x143e   :  { %v1316_v5 = vpop.eup %1315 }
0x143f   :  { %v1011_v12 = vsub.f32 1.0, %v1316_v5  ;;  %v1019_v15 = vmul.f32 %v1316_v5, %v1017_v11 }
0x1497   :  { %v1002_v6 = vpop.permute.xlu1 %1001 }
0x1498   :  { %v1004_v7 = vmul.f32 %v1316_v5, %v1002_v6 }
0x149a   :  { %1006 = vrot.lane.b32.xlu0 %v1004_v7, %s1421_s29 }
0x150c   :  { %v1007_v8 = vpop.permute.xlu0 %1006 }
0x150d   :  { %v1009_v16 = vadd.f32 %v1007_v8, %v1537_v23 }
0x150f   :  { %1317 = vtanh.f32 %v1009_v16 }
0x1519   :  { %v1318_v10 = vpop.eup %1317 }
0x151a   :  { %1013 = vrot.lane.b32.xlu1 %v1318_v10, %s1422_s2 }
0x158c   :  { %v1014_v13 = vpop.permute.xlu1 %1013 }
0x158d   :  { %v1016_v17 = vmul.f32 %v1014_v13, %v1011_v12 }
0x158f   :  { %v1020_v18 = vadd.f32 %v1019_v15, %v1016_v17 }
0x1591   :  { %v1021_v19 = vand.u32 2147483647, %v1020_v18 }
0x1593   :  { %1023 = vrot.lane.b32.xlu0 %v1021_v19, %s1422_s2 }
0x1605   :  { %v1024_v20 = vpop.permute.xlu0 %1023 }
0x1606   :  { %1027 = vst.msk [vmem:[#allocation8 - $0x7] sm:$0x80] %vm1026_vm2, %v1024_v20 }
0x1607   :  { %1396 = shalt.err (!%p1393_p0)
}
0x1608   :  { %s1397_s13 = scalar_lea.hbm %s1645_s5, 16 }
0x1609   :  { %p1398_p1 = scmp.ne.s32.totalorder %s1645_s5, %s1397_s13  ;;  %p1401_p2 = scmp.lt.u32.totalorder %s1397_s13, %s1645_s5 }
0x160b   :  { %p1403_p3 = pnand %p1401_p2, %p1398_p1 }
0x160d   :  { %1406 = shalt.err (!%p1403_p3)
}
0x160e   :  { %1037 = dma.vmem_to_hbm [thread:$0]  %s1035_s8, 16, %s1645_s5, [#allocation4]  }
0x160f   :  { %1411 = dma.done.wait [#allocation4], 16  }
0x1610   :  { %1412 = vsyncadd [#allocation4], 4294967280 }
0x1611   :  { %1041 = vsyncpa [#allocation3], 1 }
0x1612   :  { %1042 = vsyncpa [#allocation6], 1 }
0x1613   :  { %1043 = vsyncpa [#allocation4], 1 }

</bundles_post_ra>
